<compile_context>
chip_gen: v7x
topology: tpu7x:2x2x1
jax: 0.10.0
libtpu: 0.0.40
codegen_flags: <defaults>
</compile_context>

<pallas_src>
import jax
import jax.numpy as jnp
from jax.experimental import pallas as pl
from jax.experimental.pallas import tpu as pltpu


# ----------------------------------------------------------------------------
# Bilinear upsample (align_corners=True), plain JAX (pre-processing step).
# ----------------------------------------------------------------------------
def bilinear_resize_align_corners(x, out_hw):
    """NCHW bilinear resize matching F.interpolate(..., mode='bilinear', align_corners=True)."""
    B, C, h, w = x.shape
    H, W = out_hw
    if (h, w) == (H, W):
        return x

    def src_coords(n_in, n_out):
        if n_out == 1:
            return jnp.zeros((1,), jnp.float32)
        return jnp.arange(n_out, dtype=jnp.float32) * ((n_in - 1) / (n_out - 1))

    ys = src_coords(h, H)
    xs = src_coords(w, W)
    y0 = jnp.clip(jnp.floor(ys).astype(jnp.int32), 0, h - 1)
    x0 = jnp.clip(jnp.floor(xs).astype(jnp.int32), 0, w - 1)
    y1 = jnp.minimum(y0 + 1, h - 1)
    x1 = jnp.minimum(x0 + 1, w - 1)
    wy = (ys - y0.astype(jnp.float32))[:, None]   # (H, 1)
    wx = (xs - x0.astype(jnp.float32))[None, :]   # (1, W)

    g00 = x[:, :, y0[:, None], x0[None, :]]
    g01 = x[:, :, y0[:, None], x1[None, :]]
    g10 = x[:, :, y1[:, None], x0[None, :]]
    g11 = x[:, :, y1[:, None], x1[None, :]]
    top = g00 * (1.0 - wx) + g01 * wx
    bot = g10 * (1.0 - wx) + g11 * wx
    return top * (1.0 - wy) + bot * wy


# ----------------------------------------------------------------------------
# Fused Merge kernel: concat + SE + 1x1 conv + ReLU.
# ----------------------------------------------------------------------------
def make_merge_kernel(n_in, c_per_input, hw):
    """Builds the kernel for `n_in` activation inputs of `c_per_input` channels each."""
    inv_hw = 1.0 / float(hw)
    C = c_per_input

    def kernel(*refs):
        # refs = (act_0, ..., act_{n_in-1}, w1t, w2t, wc, bias, out)
        acts = refs[:n_in]
        w1t_ref, w2t_ref, wc_ref, bc_ref, o_ref = refs[n_in:]

        w1t = w1t_ref[...]                          # (Cm, Cr)
        w2t = w2t_ref[...]                          # (Cr, Cm)
        wc = wc_ref[...]                            # (Cout, Cm)

        # ---- squeeze: global average pool, accumulated per concat-chunk ----
        # pooled_i: (Bt, C) ; 1/HW folded in once on the small pooled vector.
        pooled = [jnp.sum(r[...].astype(jnp.float32), axis=-1) * inv_hw for r in acts]

        # ---- excitation fc1 (Cm -> Cr) on the MXU, chunk-accumulated; + ReLU ----
        z = None
        for i, p in enumerate(pooled):
            w_chunk = w1t[i * C:(i + 1) * C, :]     # (C, Cr)
            part = jnp.dot(p, w_chunk, preferred_element_type=jnp.float32)
            z = part if z is None else z + part
        y1 = jnp.maximum(z, 0.0)                    # (Bt, Cr)

        # ---- excitation fc2 (Cr -> Cm) + sigmoid ----
        y2 = jax.nn.sigmoid(
            jnp.dot(y1, w2t, preferred_element_type=jnp.float32))   # (Bt, Cm)

        # ---- 1x1 conv with the SE scale folded into per-batch weights ----
        #   out[b,o,s] = sum_c (wc[o,c] * y2[b,c]) * m[b,c,s]
        acc = None
        for i, r in enumerate(acts):
            y_chunk = y2[:, i * C:(i + 1) * C]                     # (Bt, C)
            w_chunk = wc[:, i * C:(i + 1) * C]                     # (Cout, C)
            wb = w_chunk[None, :, :] * y_chunk[:, None, :]         # (Bt, Cout, C)
            part = jnp.einsum('boc,bcs->bos', wb, r[...].astype(jnp.float32),
                              preferred_element_type=jnp.float32)  # (Bt, Cout, HW)
            acc = part if acc is None else acc + part

        out = acc + bc_ref[...][None, :, :]                        # + (1, Cout, 1)
        o_ref[...] = jnp.maximum(out, 0.0).astype(o_ref.dtype)

    return kernel


def merge_forward(skips, x, w1, w2, wc, bc, *,
                  target_block_bytes=2 << 20, max_bt=8):
    """Forward pass of `Merge`.

    skips : list of (B, C, H, W) float arrays
    x     : (B, C, h, w) float array (bilinear-upsampled to (H, W) if needed)
    w1    : (Cr, Cm)  SE fc1 weight (bias-free),  Cm = C * (len(skips)+1)
    w2    : (Cm, Cr)  SE fc2 weight (bias-free)
    wc    : (Cout, Cm) 1x1 conv weight (Cout = C)
    bc    : (Cout,)    1x1 conv bias
    """
    skips = list(skips)
    shape = skips[0].shape[2:]
    if x.shape[2:] != shape:
        x = bilinear_resize_align_corners(x, shape)

    acts = skips + [x]
    n_in = len(acts)
    B, C, H, W = acts[0].shape
    HW = H * W
    Cm = C * n_in
    Cr = w1.shape[0]
    Cout = wc.shape[0]

    acts_flat = [a.reshape(B, C, HW) for a in acts]

    # --- batch tile: biggest block under ~target_block_bytes that divides B ---
    per_item_bytes = (Cm + Cout) * HW * 4
    Bt = max(1, min(B, max_bt, target_block_bytes // max(per_item_bytes, 1)))
    while B % Bt:
        Bt -= 1

    # Pre-transpose the SE weights once (host/XLA side) so the kernel does
    # straight (M,K)@(K,N) MXU matmuls with no in-kernel transposes.
    w1t = jnp.transpose(w1)          # (Cm, Cr)
    w2t = jnp.transpose(w2)          # (Cr, Cm)
    bc2 = bc.reshape(Cout, 1)

    # Explicit VMEM budget: double-buffered activation blocks + resident weights.
    weights_bytes = (Cm * Cr * 2 + Cout * Cm + Cout) * 4
    vmem_est = 2 * Bt * (Cm + Cout) * HW * 4 + 2 * weights_bytes + (2 << 20)
    vmem_limit = int(min(max(vmem_est, 16 << 20), 56 << 20))

    kernel = make_merge_kernel(n_in, C, HW)

    act_spec = pl.BlockSpec((Bt, C, HW), lambda b: (b, 0, 0))
    out_flat = pl.pallas_call(
        kernel,
        out_shape=jax.ShapeDtypeStruct((B, Cout, HW), x.dtype),
        grid_spec=pltpu.PrefetchScalarGridSpec(
            num_scalar_prefetch=0,
            grid=(B // Bt,),
            in_specs=[act_spec] * n_in + [
                pl.BlockSpec((Cm, Cr), lambda b: (0, 0)),     # w1t (resident)
                pl.BlockSpec((Cr, Cm), lambda b: (0, 0)),     # w2t (resident)
                pl.BlockSpec((Cout, Cm), lambda b: (0, 0)),   # conv weight
                pl.BlockSpec((Cout, 1), lambda b: (0, 0)),    # conv bias
            ],
            out_specs=pl.BlockSpec((Bt, Cout, HW), lambda b: (b, 0, 0)),
        ),
        compiler_params=pltpu.CompilerParams(
            dimension_semantics=("parallel",),
            vmem_limit_bytes=vmem_limit,
        ),
    )(*acts_flat, w1t, w2t, wc, bc2)

    return out_flat.reshape(B, Cout, H, W)


# ----------------------------------------------------------------------------
# Plain-JAX reference matching the PyTorch module.
# ----------------------------------------------------------------------------
def merge_reference(skips, x, w1, w2, wc, bc):
    shape = skips[0].shape[2:]
    if x.shape[2:] != shape:
        x = bilinear_resize_align_corners(x, shape)
    m = jnp.concatenate(list(skips) + [x], axis=1)          # (B, Cm, H, W)
    y = jnp.mean(m, axis=(2, 3))                            # AdaptiveAvgPool2d(1)
    y = jnp.maximum(y @ w1.T, 0.0)                          # Linear + ReLU
    y = jax.nn.sigmoid(y @ w2.T)                            # Linear + Sigmoid
    z = m * y[:, :, None, None]                             # SE scale
    out = jnp.einsum('oc,bchw->bohw', wc, z) + bc[None, :, None, None]
    return jnp.maximum(out, 0.0)                            # 1x1 conv + ReLU


if __name__ == "__main__":
    key = jax.random.PRNGKey(0)

    def make_weights(k, cm, cr, cout):
        k1, k2, k3, k4 = jax.random.split(k, 4)
        b1 = 1.0 / (cm ** 0.5)
        b2 = 1.0 / (cr ** 0.5)
        w1 = jax.random.uniform(k1, (cr, cm), jnp.float32, -b1, b1)
        w2 = jax.random.uniform(k2, (cm, cr), jnp.float32, -b2, b2)
        wc = jax.random.uniform(k3, (cout, cm), jnp.float32, -b1, b1)
        bc = jax.random.uniform(k4, (cout,), jnp.float32, -b1, b1)
        return w1, w2, wc, bc

    # --- test 1: skips_num=1, x already at skip resolution ---
    B, C, H, W = 2, 8, 16, 16
    skips_num = 1
    Cm = C * (skips_num + 1)
    red = max(2, Cm // 8)
    Cr = Cm // red
    k0, k1, k2, kw = jax.random.split(key, 4)
    skips = [jax.random.normal(k0, (B, C, H, W), jnp.float32)]
    x = jax.random.normal(k1, (B, C, H, W), jnp.float32)
    w1, w2, wc, bc = make_weights(kw, Cm, Cr, C)

    out = jax.block_until_ready(merge_forward(skips, x, w1, w2, wc, bc))
    ref = merge_reference(skips, x, w1, w2, wc, bc)
    assert out.shape == (B, C, H, W)
    assert float(jnp.max(jnp.abs(out - ref))) < 1e-4

    # --- test 2: skips_num=2, x needs bilinear upsampling (8x8 -> 16x16) ---
    skips_num = 2
    Cm = C * (skips_num + 1)
    red = max(2, Cm // 8)
    Cr = Cm // red
    keys = jax.random.split(k2, 4)
    skips2 = [jax.random.normal(keys[i], (B, C, H, W), jnp.float32) for i in range(2)]
    x_small = jax.random.normal(keys[2], (B, C, H // 2, W // 2), jnp.float32)
    w1b, w2b, wcb, bcb = make_weights(keys[3], Cm, Cr, C)

    out2 = jax.block_until_ready(merge_forward(skips2, x_small, w1b, w2b, wcb, bcb))
    ref2 = merge_reference(skips2, x_small, w1b, w2b, wcb, bcb)
    assert out2.shape == (B, C, H, W)
    assert float(jnp.max(jnp.abs(out2 - ref2))) < 1e-4

    print("KERNEL_OK")
</pallas_src>

<mosaic_0001>
module attributes {stable_mosaic.version = 11 : i64} {
  func.func @kernel(%arg0: i32, %arg1: memref<2x8x256xf32, #tpu.memory_space<vmem>>, %arg2: memref<2x8x256xf32, #tpu.memory_space<vmem>>, %arg3: memref<16x8xf32, #tpu.memory_space<vmem>>, %arg4: memref<8x16xf32, #tpu.memory_space<vmem>>, %arg5: memref<8x16xf32, #tpu.memory_space<vmem>>, %arg6: memref<8x1xf32, #tpu.memory_space<vmem>>, %arg7: memref<2x8x256xf32, #tpu.memory_space<vmem>>) attributes {dimension_semantics = [#tpu.dimension_semantics<parallel>], iteration_bounds = array<i64: 1>, scalar_prefetch = 0 : i64, scratch_operands = 0 : i64, tpu.core_type = #tpu.core_type<tc>, window_params = [{transform_indices = @transform_0, window_bounds = array<i64: 2, 8, 256>}, {transform_indices = @transform_1, window_bounds = array<i64: 2, 8, 256>}, {pipeline_mode = #tpu.pipeline_mode<synchronous>, transform_indices = @transform_2, window_bounds = array<i64: 16, 8>}, {pipeline_mode = #tpu.pipeline_mode<synchronous>, transform_indices = @transform_3, window_bounds = array<i64: 8, 16>}, {pipeline_mode = #tpu.pipeline_mode<synchronous>, transform_indices = @transform_4, window_bounds = array<i64: 8, 16>}, {pipeline_mode = #tpu.pipeline_mode<synchronous>, transform_indices = @transform_5, window_bounds = array<i64: 8, 1>}, {transform_indices = @transform_6, window_bounds = array<i64: 2, 8, 256>}]} {
    %c0 = arith.constant 0 : index
    %c0_0 = arith.constant 0 : index
    %0 = vector.load %arg3[%c0, %c0_0] : memref<16x8xf32, #tpu.memory_space<vmem>>, vector<16x8xf32>
    %c0_1 = arith.constant 0 : index
    %c0_2 = arith.constant 0 : index
    %1 = vector.load %arg4[%c0_1, %c0_2] : memref<8x16xf32, #tpu.memory_space<vmem>>, vector<8x16xf32>
    %c0_3 = arith.constant 0 : index
    %c0_4 = arith.constant 0 : index
    %2 = vector.load %arg5[%c0_3, %c0_4] : memref<8x16xf32, #tpu.memory_space<vmem>>, vector<8x16xf32>
    %c0_5 = arith.constant 0 : index
    %c0_6 = arith.constant 0 : index
    %c0_7 = arith.constant 0 : index
    %3 = vector.load %arg1[%c0_5, %c0_6, %c0_7] : memref<2x8x256xf32, #tpu.memory_space<vmem>>, vector<2x8x256xf32>
    %cst = arith.constant dense<0.000000e+00> : vector<2x8xf32>
    %4 = vector.multi_reduction <add>, %3, %cst [2] : vector<2x8x256xf32> to vector<2x8xf32>
    %cst_8 = arith.constant 3.906250e-03 : f32
    %5 = vector.broadcast %cst_8 : f32 to vector<2x8xf32>
    %6 = arith.mulf %4, %5 : vector<2x8xf32>
    %c0_9 = arith.constant 0 : index
    %c0_10 = arith.constant 0 : index
    %c0_11 = arith.constant 0 : index
    %7 = vector.load %arg2[%c0_9, %c0_10, %c0_11] : memref<2x8x256xf32, #tpu.memory_space<vmem>>, vector<2x8x256xf32>
    %cst_12 = arith.constant dense<0.000000e+00> : vector<2x8xf32>
    %8 = vector.multi_reduction <add>, %7, %cst_12 [2] : vector<2x8x256xf32> to vector<2x8xf32>
    %cst_13 = arith.constant 3.906250e-03 : f32
    %9 = vector.broadcast %cst_13 : f32 to vector<2x8xf32>
    %10 = arith.mulf %8, %9 : vector<2x8xf32>
    %11 = vector.extract_strided_slice %0 {offsets = [0, 0], sizes = [8, 8], strides = [1, 1]} : vector<16x8xf32> to vector<8x8xf32>
    %cst_14 = arith.constant dense<0.000000e+00> : vector<2x8xf32>
    %12 = tpu.matmul %6, %11, %cst_14 {dimension_numbers = #tpu.dot_dimension_numbers<[1], [0], [0], [1], [0, 0, 1, 1], [], []>} : vector<2x8xf32>, vector<8x8xf32>, vector<2x8xf32> -> vector<2x8xf32>
    %13 = vector.extract_strided_slice %0 {offsets = [8, 0], sizes = [8, 8], strides = [1, 1]} : vector<16x8xf32> to vector<8x8xf32>
    %cst_15 = arith.constant dense<0.000000e+00> : vector<2x8xf32>
    %14 = tpu.matmul %10, %13, %cst_15 {dimension_numbers = #tpu.dot_dimension_numbers<[1], [0], [0], [1], [0, 0, 1, 1], [], []>} : vector<2x8xf32>, vector<8x8xf32>, vector<2x8xf32> -> vector<2x8xf32>
    %15 = arith.addf %12, %14 : vector<2x8xf32>
    %cst_16 = arith.constant 0.000000e+00 : f32
    %16 = vector.broadcast %cst_16 : f32 to vector<2x8xf32>
    %17 = arith.maximumf %15, %16 : vector<2x8xf32>
    %cst_17 = arith.constant dense<0.000000e+00> : vector<2x16xf32>
    %18 = tpu.matmul %17, %1, %cst_17 {dimension_numbers = #tpu.dot_dimension_numbers<[1], [0], [0], [1], [0, 0, 1, 1], [], []>} : vector<2x8xf32>, vector<8x16xf32>, vector<2x16xf32> -> vector<2x16xf32>
    %19 = arith.negf %18 : vector<2x16xf32>
    %20 = math.exp %19 : vector<2x16xf32>
    %cst_18 = arith.constant 1.000000e+00 : f32
    %21 = vector.broadcast %cst_18 : f32 to vector<2x16xf32>
    %22 = arith.addf %21, %20 : vector<2x16xf32>
    %23 = arith.divf %21, %22 : vector<2x16xf32>
    %24 = vector.extract_strided_slice %23 {offsets = [0, 0], sizes = [2, 8], strides = [1, 1]} : vector<2x16xf32> to vector<2x8xf32>
    %25 = vector.extract_strided_slice %2 {offsets = [0, 0], sizes = [8, 8], strides = [1, 1]} : vector<8x16xf32> to vector<8x8xf32>
    %26 = vector.shape_cast %25 : vector<8x8xf32> to vector<1x8x8xf32>
    %27 = vector.shape_cast %24 : vector<2x8xf32> to vector<2x1x8xf32>
    %28 = vector.broadcast %26 : vector<1x8x8xf32> to vector<2x8x8xf32>
    %29 = vector.broadcast %27 : vector<2x1x8xf32> to vector<2x8x8xf32>
    %30 = arith.mulf %28, %29 : vector<2x8x8xf32>
    %c0_19 = arith.constant 0 : index
    %c0_20 = arith.constant 0 : index
    %c0_21 = arith.constant 0 : index
    %31 = vector.load %arg1[%c0_19, %c0_20, %c0_21] : memref<2x8x256xf32, #tpu.memory_space<vmem>>, vector<2x8x256xf32>
    "tpu.trace_start"() <{level = 10 : i32, message = "boc,bcs->bos"}> : () -> ()
    %cst_22 = arith.constant dense<0.000000e+00> : vector<2x8x256xf32>
    %32 = tpu.matmul %30, %31, %cst_22 {dimension_numbers = #tpu.dot_dimension_numbers<[2], [1], [1], [2], [0, 0, 0, 1, 1, 2], [0], [0]>} : vector<2x8x8xf32>, vector<2x8x256xf32>, vector<2x8x256xf32> -> vector<2x8x256xf32>
    "tpu.trace_stop"() : () -> ()
    %33 = vector.extract_strided_slice %23 {offsets = [0, 8], sizes = [2, 8], strides = [1, 1]} : vector<2x16xf32> to vector<2x8xf32>
    %34 = vector.extract_strided_slice %2 {offsets = [0, 8], sizes = [8, 8], strides = [1, 1]} : vector<8x16xf32> to vector<8x8xf32>
    %35 = vector.shape_cast %34 : vector<8x8xf32> to vector<1x8x8xf32>
    %36 = vector.shape_cast %33 : vector<2x8xf32> to vector<2x1x8xf32>
    %37 = vector.broadcast %35 : vector<1x8x8xf32> to vector<2x8x8xf32>
    %38 = vector.broadcast %36 : vector<2x1x8xf32> to vector<2x8x8xf32>
    %39 = arith.mulf %37, %38 : vector<2x8x8xf32>
    %c0_23 = arith.constant 0 : index
    %c0_24 = arith.constant 0 : index
    %c0_25 = arith.constant 0 : index
    %40 = vector.load %arg2[%c0_23, %c0_24, %c0_25] : memref<2x8x256xf32, #tpu.memory_space<vmem>>, vector<2x8x256xf32>
    "tpu.trace_start"() <{level = 10 : i32, message = "boc,bcs->bos"}> : () -> ()
    %cst_26 = arith.constant dense<0.000000e+00> : vector<2x8x256xf32>
    %41 = tpu.matmul %39, %40, %cst_26 {dimension_numbers = #tpu.dot_dimension_numbers<[2], [1], [1], [2], [0, 0, 0, 1, 1, 2], [0], [0]>} : vector<2x8x8xf32>, vector<2x8x256xf32>, vector<2x8x256xf32> -> vector<2x8x256xf32>
    "tpu.trace_stop"() : () -> ()
    %42 = arith.addf %32, %41 : vector<2x8x256xf32>
    %c0_27 = arith.constant 0 : index
    %c0_28 = arith.constant 0 : index
    %43 = vector.load %arg6[%c0_27, %c0_28] : memref<8x1xf32, #tpu.memory_space<vmem>>, vector<8x1xf32>
    %44 = vector.shape_cast %43 : vector<8x1xf32> to vector<1x8x1xf32>
    %45 = vector.broadcast %44 : vector<1x8x1xf32> to vector<2x8x256xf32>
    %46 = arith.addf %42, %45 : vector<2x8x256xf32>
    %cst_29 = arith.constant 0.000000e+00 : f32
    %47 = vector.broadcast %cst_29 : f32 to vector<2x8x256xf32>
    %48 = arith.maximumf %46, %47 : vector<2x8x256xf32>
    %c0_30 = arith.constant 0 : index
    %c0_31 = arith.constant 0 : index
    %c0_32 = arith.constant 0 : index
    %49 = vector.load %arg7[%c0_30, %c0_31, %c0_32] : memref<2x8x256xf32, #tpu.memory_space<vmem>>, vector<2x8x256xf32>
    tpu.vector_store %arg7[%c0_30, %c0_31, %c0_32], %48 {strides = array<i32>} : memref<2x8x256xf32, #tpu.memory_space<vmem>>, vector<2x8x256xf32>,
    return
  }
  func.func @transform_0(%arg0: i32) -> (i32, i32, i32) {
    %c0_i32 = arith.constant 0 : i32
    %c0_i32_0 = arith.constant 0 : i32
    %c0_i32_1 = arith.constant 0 : i32
    return %arg0, %c0_i32, %c0_i32_0 : i32, i32, i32
  }
  func.func @transform_1(%arg0: i32) -> (i32, i32, i32) {
    %c0_i32 = arith.constant 0 : i32
    %c0_i32_0 = arith.constant 0 : i32
    %c0_i32_1 = arith.constant 0 : i32
    return %arg0, %c0_i32, %c0_i32_0 : i32, i32, i32
  }
  func.func @transform_2(%arg0: i32) -> (i32, i32) {
    %c0_i32 = arith.constant 0 : i32
    %c0_i32_0 = arith.constant 0 : i32
    %c0_i32_1 = arith.constant 0 : i32
    return %c0_i32, %c0_i32_0 : i32, i32
  }
  func.func @transform_3(%arg0: i32) -> (i32, i32) {
    %c0_i32 = arith.constant 0 : i32
    %c0_i32_0 = arith.constant 0 : i32
    %c0_i32_1 = arith.constant 0 : i32
    return %c0_i32, %c0_i32_0 : i32, i32
  }
  func.func @transform_4(%arg0: i32) -> (i32, i32) {
    %c0_i32 = arith.constant 0 : i32
    %c0_i32_0 = arith.constant 0 : i32
    %c0_i32_1 = arith.constant 0 : i32
    return %c0_i32, %c0_i32_0 : i32, i32
  }
  func.func @transform_5(%arg0: i32) -> (i32, i32) {
    %c0_i32 = arith.constant 0 : i32
    %c0_i32_0 = arith.constant 0 : i32
    %c0_i32_1 = arith.constant 0 : i32
    return %c0_i32, %c0_i32_0 : i32, i32
  }
  func.func @transform_6(%arg0: i32) -> (i32, i32, i32) {
    %c0_i32 = arith.constant 0 : i32
    %c0_i32_0 = arith.constant 0 : i32
    %c0_i32_1 = arith.constant 0 : i32
    return %arg0, %c0_i32, %c0_i32_0 : i32, i32, i32
  }
}

</mosaic_0001>

<bundles_post_ra>
// kernel: tpu_custom_call.1
= control target key start
LH: loop header
LB: loop body
LE: loop exit
PB: predicated region body
PF: predicated region fallthrough
CT: control target
= control target key end

     0   :  { %11 = vsyncpa [#allocation3], 0  ;;  %s963_s0 = inlined_call_operand.vmem [shape: f32[2,8,256], index: 0, kind: input, shape index: {}]   ;;  %s964_s1 = inlined_call_operand.hbm [shape: f32[2,8,256], index: 1, kind: input, shape index: {}]   ;;  %s965_s2 = inlined_call_operand.vmem [shape: f32[16,8], index: 2, kind: input, shape index: {}]   ;;  %s966_s3 = inlined_call_operand.hbm [shape: f32[8,16], index: 3, kind: input, shape index: {}]   ;;  %s967_s4 = inlined_call_operand.vmem [shape: f32[8,16], index: 4, kind: input, shape index: {}]   ;;  %s968_s5 = inlined_call_operand.vmem [shape: f32[8,1], index: 5, kind: input, shape index: {}]   ;;  %s969_s6 = inlined_call_operand.hbm [shape: f32[2,8,256], index: 6, kind: output, shape index: {}]  }
   0x1   :  { %12 = vsyncpa [#allocation6], 0 }
   0x2   :  { %13 = vsyncpa [#allocation4], 0  ;;  %s824_s21 = smov [#allocation2]   ;;  %s752_s25 = scalar_lea.hbm %s964_s1, 512 }
   0x3   :  { %s21_s22 = sshll.u32 %s824_s21, 4  ;;  %p753_p0 = scmp.ne.s32.totalorder %s964_s1, %s752_s25  ;;  %s22_s22 = int_to_ptr.vmem [resolvable:$true] %s21_s22 }
   0x4   :  { %p756_p1 = scmp.lt.u32.totalorder %s752_s25, %s964_s1 }
   0x6   :  { %p758_p2 = pnand %p756_p1, %p753_p0 }
   0x8   :  { %761 = shalt.err (!%p758_p2)
}
   0x9   :  { %s762_s30 = scalar_lea.vmem %s22_s22, 512  ;;  %p767_p4 = scmp.lt.s32.totalorder %s22_s22, %s22_s22 }
   0xa   :  { %p763_p3 = scmp.ne.s32.totalorder %s22_s22, %s762_s30  ;;  %p768_p5 = scmp.lt.s32.totalorder %s762_s30, %s762_s30 }
   0xc   :  { %p769_p6 = por %p768_p5, %p767_p4 }
   0xe   :  { %p770_p7 = pnand %p769_p6, %p763_p3 }
  0x10   :  { %773 = shalt.err (!%p770_p7)
}
  0x11   :  { %s825_s7 = smov 256   ;;  %s826_s8 = smov 16  }
  0x12   :  { %27 = dma.hbm_to_vmem [thread:$0]  %s964_s1, 512, %s22_s22, [#allocation3], %s825_s7, %s825_s7, %s826_s8  }
  0x13   :  { %s827_s11 = smov [#allocation5]   ;;  %s774_s15 = scalar_lea.hbm %s966_s3, 128 }
  0x14   :  { %s36_s12 = sshll.u32 %s827_s11, 4  ;;  %p775_p8 = scmp.ne.s32.totalorder %s966_s3, %s774_s15  ;;  %s37_s12 = int_to_ptr.vmem [resolvable:$true] %s36_s12 }
  0x15   :  { %p778_p9 = scmp.lt.u32.totalorder %s774_s15, %s966_s3 }
  0x17   :  { %p780_p10 = pnand %p778_p9, %p775_p8 }
  0x19   :  { %783 = shalt.err (!%p780_p10)
}
  0x1a   :  { %s784_s20 = scalar_lea.vmem %s37_s12, 128  ;;  %p789_p12 = scmp.lt.s32.totalorder %s37_s12, %s37_s12 }
  0x1b   :  { %p785_p11 = scmp.ne.s32.totalorder %s37_s12, %s784_s20  ;;  %p790_p13 = scmp.lt.s32.totalorder %s784_s20, %s784_s20 }
  0x1d   :  { %p791_p0 = por %p790_p13, %p789_p12 }
  0x1f   :  { %p792_p1 = pnand %p791_p0, %p785_p11 }
  0x21   :  { %795 = shalt.err (!%p792_p1)
}
  0x22   :  { %39 = dma.hbm_to_vmem [thread:$0]  %s966_s3, 128, %s37_s12, [#allocation6]  }
  0x23   :  { %818 = dma.done.wait [#allocation3], 512  }
  0x24   :  { %819 = vsyncadd [#allocation3], 4294966784 }
  0x25   :  { %820 = dma.done.wait [#allocation6], 128  }
  0x26   :  { %821 = vsyncadd [#allocation6], 4294967168  ;;  %v66_v0 = vld [vmem:[#allocation2] sm:$0xff]  ;;  %v67_v1 = vld [vmem:[#allocation2 + $0x8] sm:$0xff]  ;;  %v828_v12 = vmov 0.0   ;;  %vm829_vm0 = vmmov 0   ;;  %v80_v14 = vlaneseq }
  0x27   :  { %v68_v2 = vld [vmem:[#allocation2 + $0x10] sm:$0xff]  ;;  %v70_v3 = vadd.f32 %v67_v1, %v66_v0  ;;  %v69_v4 = vld [vmem:[#allocation2 + $0x18] sm:$0xff]  ;;  %v899_v5 = vld [vmem:[%s963_s0] sm:$0xff]  ;;  %715 = vmatprep.subr.mxu0 %v828_v12  ;;  %725 = vmatprep.subr.mxu1 %v828_v12  ;;  %vm90_vm1 = vcmask 1041409   ;;  %vm92_vm2 = vcmask 64512   ;;  %v831_v56 = vmov 0  }
  0x28   :  { %v55_v6 = vld [vmem:[%s963_s0 + $0x8] sm:$0xff]  ;;  %v908_v8 = vld [vmem:[%s963_s0 + $0x10] sm:$0xff]  ;;  %v57_v9 = vld [vmem:[%s963_s0 + $0x18] sm:$0xff]  ;;  %v73_v10 = vadd.f32 %v69_v4, %v68_v2  ;;  %717 = vmatprep.mubr.msk.f32.mxu0 %vm829_vm0, %v828_v12  ;;  %727 = vmatprep.mubr.msk.f32.mxu1 %vm829_vm0, %v828_v12  ;;  %v81_v15 = vand.u32 127, %v80_v14  ;;  %v83_v16 = vshrl.u32 %v80_v14, 7  ;;  %s832_s11 = smov 120  }
  0x29   :  { %v58_v7 = vadd.f32 %v55_v6, %v899_v5  ;;  %71 = vadd.xlane.f32.xlu0 %v70_v3  ;;  %v61_v11 = vadd.f32 %v57_v9, %v908_v8  ;;  %v51_v13 = vld [vmem:[%s965_s2 + $0x8] sm:$0xff]  ;;  %v50_v26 = vld [vmem:[%s965_s2] sm:$0xff]  ;;  %v830_v42 = vmov 1966171168   ;;  %746 = vset.pattern.permute.xlu1 %v831_v56 }
  0x2a   :  { %716 = vmatpush3.msra.mxu0 %v51_v13  ;;  %v84_v19 = vsub.s32 %v81_v15, %v83_v16  ;;  %v52_v33 = vld [vmem:[#allocation5] sm:$0xff]  ;;  %v330_v43 = vunpack.c.l.s4 %v830_v42  ;;  %v353_v48 = vsub.s32 0, %v83_v16  ;;  %747 = vset.pattern.permute.xlu0 %v831_v56 }
  0x2b   :  { %59 = vadd.xlane.f32.xlu1 %v58_v7  ;;  %720 = vmatprep.subr.mxu0 %v828_v12  ;;  %v53_v51 = vld [vmem:[%s967_s4] sm:$0xff]  ;;  %s833_s4 = smov [#allocation7]  }
  0x2c   :  { %726 = vmatpush3.msra.mxu1 %v52_v33  ;;  %v331_v44 = vunpack.c.0.s8 %v330_v43  ;;  %v665_v58 = vld [vmem:[%s968_s5] sm:$0xff]  ;;  %s688_s5 = sshll.u32 %s833_s4, 4  ;;  %s689_s5 = int_to_ptr.vmem [resolvable:$true] %s688_s5 }
  0x2d   :  { %74 = vadd.xlane.f32.xlu0 %v73_v10  ;;  %372 = vmatprep.subr.mxu1 %v67_v1  ;;  %s796_s14 = scalar_lea.vmem %s689_s5, 512  ;;  %p801_p3 = scmp.lt.s32.totalorder %s689_s5, %s689_s5 }
  0x2e   :  { %v334_v45 = vsub.s32 %v331_v44, %v83_v16  ;;  %p797_p2 = scmp.ne.s32.totalorder %s689_s5, %s796_s14  ;;  %p802_p4 = scmp.lt.s32.totalorder %s796_s14, %s796_s14 }
  0x2f   :  { %62 = vadd.xlane.f32.xlu1 %v61_v11 }
  0x30   :  { %p803_p5 = por %p802_p4, %p801_p3 }
  0x32   :  { %p804_p6 = pnand %p803_p5, %p797_p2 }
  0xb6   :  { %v72_v17 = vpop.xlane.xlu0 %71 }
  0xb7   :  { %v76_v20 = vmul.f32 0.00390625, %v72_v17 }
  0xb8   :  { %v60_v18 = vpop.xlane.xlu1 %59 }
  0xb9   :  { %v85_v24 = vrot.slane %v76_v20, %v84_v19  ;;  %v64_v27 = vmul.f32 0.00390625, %v60_v18 }
  0xba   :  { %v75_v21 = vpop.xlane.xlu0 %74 }
  0xbb   :  { %v77_v22 = vmul.f32 0.00390625, %v75_v21  ;;  %v170_v30 = vrot.slane %v64_v27, %v84_v19 }
  0xbc   :  { %v63_v23 = vpop.xlane.xlu1 %62 }
  0xbd   :  { %v89_v25 = vrot.slane %v77_v22, %v84_v19  ;;  %v65_v28 = vmul.f32 0.00390625, %v63_v23 }
  0xbf   :  { %v91_v29 = vsel %vm90_vm1, %v89_v25, %v85_v24  ;;  %v174_v31 = vrot.slane %v65_v28, %v84_v19 }
  0xc0   :  { %718 = vmatmul.mubr.msk.f32.vlgmr.msra.gmra.mrb[0].mxu0 %vm92_vm2, %v91_v29 }
  0xc1   :  { %721 = vmatpush3.msra.mxu0 %v50_v26  ;;  %722 = vmatprep.mubr.msk.f32.mxu0 %vm829_vm0, %v828_v12  ;;  %v175_v32 = vsel %vm90_vm1, %v174_v31, %v170_v30 }
  0xc2   :  { %448 = vmatprep.subr.mxu0 %v69_v4 }
  0xc8   :  { %723 = vmatmul.mubr.msk.f32.vlgmr.msra.gmra.mrb[0].mxu0 %vm92_vm2, %v175_v32 }
  0xc9   :  { %449 = vmatpush1.msra.mxu0 %v68_v2  ;;  %512 = vmatprep.mubr.f32.mxu0 %v828_v12 }
  0xca   :  { %594 = vmatprep.subr.mxu0 %v57_v9 }
 0x19b   :  { %v244_v34 = vpop.f32.mrb[0].mxu0 }
 0x19c   :  { %v248_v35 = vmax.f32 %v244_v34, 0.0  ;;  %v724_v36 = vpop.f32.mrb[1].mxu0 }
 0x19e   :  { %728 = vmatmul.mubr.msk.f32.vlgmr.msra.gmra.mrb[0].mxu1 %vm92_vm2, %v248_v35 }
 0x19f   :  { %373 = vmatpush1.msra.mxu1 %v66_v0  ;;  %436 = vmatprep.mubr.f32.mxu1 %v828_v12 }
 0x1a0   :  { %521 = vmatprep.subr.mxu1 %v55_v6 }
 0x271   :  { %v318_v37 = vpop.f32.mrb[0].mxu1 }
 0x272   :  { %v704_v38 = vmul.f32 -1.442695, %v318_v37  ;;  %v729_v39 = vpop.f32.mrb[1].mxu1 }
 0x274   :  { %748 = vpow2.f32 %v704_v38 }
 0x27e   :  { %v749_v40 = vpop.eup %748 }
 0x27f   :  { %v325_v41 = vadd.f32 1.0, %v749_v40 }
 0x281   :  { %750 = vrcp.f32 %v325_v41 }
 0x28b   :  { %v751_v46 = vpop.eup %750 }
 0x28c   :  { %v335_v47 = vrot.slane %v751_v46, %v334_v45 }
 0x28e   :  { %v343_v49 = vrot.slane %v335_v47, %v334_v45  ;;  %v336_v50 = vcombine.high %v335_v47, %v335_v47 }
 0x290   :  { %v354_v52 = vrot.slane %v343_v49, %v353_v48  ;;  %v350_v53 = vrot.slane %v336_v50, %v334_v45 }
 0x292   :  { %v361_v54 = vmul.f32 %v354_v52, %v53_v51  ;;  %v358_v55 = vrot.slane %v350_v53, %v353_v48 }
 0x294   :  { %368 = vrot.lane.b32.xlu0 %v361_v54, %s832_s11  ;;  %v362_v57 = vmul.f32 %v358_v55, %v53_v51 }
 0x296   :  { %444 = vrot.lane.b32.xlu1 %v362_v57, %s832_s11 }
 0x29a   :  { %668 = vperm.xlu1 %746, %v665_v58  }
 0x306   :  { %v369_v59 = vpop.permute.xlu0 %368 }
 0x307   :  { %705 = vmatmul.mubr.msk.f32.vlgmr.msra.gmra.mrb[2].mxu1 %vm92_vm2, %v369_v59 }
 0x308   :  { %v445_v60 = vpop.permute.xlu1 %444  ;;  %522 = vmatpush1.msra.mxu1 %v899_v5  ;;  %585 = vmatprep.mubr.f32.mxu1 %v828_v12 }
 0x309   :  { %706 = vmatmul.mubr.msk.f32.vlgmr.msra.gmra.mrb[2].mxu0 %vm92_vm2, %v445_v60 }
 0x30a   :  { %595 = vmatpush1.msra.mxu0 %v908_v8  ;;  %658 = vmatprep.mubr.f32.mxu0 %v828_v12 }
 0x30f   :  { %707 = vmatmul.mubr.msk.f32.vlgmr.msra.gmra.mrb[2].mxu1 %vm92_vm2, %v361_v54 }
 0x311   :  { %708 = vmatmul.mubr.msk.f32.vlgmr.msra.gmra.mrb[2].mxu0 %vm92_vm2, %v362_v57 }
 0x319   :  { %v669_v61 = vpop.permute.xlu1 %668 }
 0x3e2   :  { %v587_v62 = vpop.f32.mrb[2].mxu1 }
 0x3e3   :  { %v671_v63 = vadd.f32 %v669_v61, %v587_v62  ;;  %v589_v0 = vpop.f32.mrb[3].mxu1 }
 0x3e4   :  { %v672_v1 = vadd.f32 %v669_v61, %v589_v0  ;;  %v660_v2 = vpop.f32.mrb[2].mxu0 }
 0x3e5   :  { %v675_v3 = vmax.f32 %v671_v63, 0.0  ;;  %v673_v4 = vadd.f32 %v669_v61, %v660_v2  ;;  %v662_v5 = vpop.f32.mrb[3].mxu0 }
 0x3e6   :  { %v676_v6 = vmax.f32 %v672_v1, 0.0  ;;  %v674_v7 = vadd.f32 %v669_v61, %v662_v5 }
 0x3e7   :  { %679 = vst [vmem:[#allocation7] sm:$0xff] %v675_v3  ;;  %v677_v8 = vmax.f32 %v673_v4, 0.0 }
 0x3e8   :  { %680 = vst [vmem:[#allocation7 + $0x8] sm:$0xff] %v676_v6  ;;  %v678_v9 = vmax.f32 %v674_v7, 0.0 }
 0x3e9   :  { %681 = vst [vmem:[#allocation7 + $0x10] sm:$0xff] %v677_v8 }
 0x3ea   :  { %682 = vst [vmem:[#allocation7 + $0x18] sm:$0xff] %v678_v9 }
 0x3eb   :  { %807 = shalt.err (!%p804_p6)
}
 0x3ec   :  { %s808_s17 = scalar_lea.hbm %s969_s6, 512 }
 0x3ed   :  { %p809_p7 = scmp.ne.s32.totalorder %s969_s6, %s808_s17  ;;  %p812_p8 = scmp.lt.u32.totalorder %s808_s17, %s969_s6 }
 0x3ef   :  { %p814_p9 = pnand %p812_p8, %p809_p7 }
 0x3f1   :  { %817 = shalt.err (!%p814_p9)
}
 0x3f2   :  { %694 = dma.vmem_to_hbm [thread:$0]  %s689_s5, 512, %s969_s6, [#allocation4], %s825_s7, %s825_s7, %s826_s8  }
 0x3f3   :  { %822 = dma.done.wait [#allocation4], 512  }
 0x3f4   :  { %823 = vsyncadd [#allocation4], 4294966784 }
 0x3f5   :  { %698 = vsyncpa [#allocation3], 1 }
 0x3f6   :  { %699 = vsyncpa [#allocation6], 1 }
 0x3f7   :  { %700 = vsyncpa [#allocation4], 1 }

</bundles_post_ra>
